<compile_context>
chip_gen: v6e
topology: v6e:2x2x1
jax: 0.10.0
libtpu: 0.0.40
codegen_flags: <defaults>
</compile_context>

<pallas_src>
import functools

import jax
import jax.numpy as jnp
from jax import lax
from jax.experimental import pallas as pl
from jax.experimental.pallas import tpu as pltpu


def _ce_label_smooth_kernel(x_ref, t_ref, out_ref, *, epsilon, num_classes,
                            tile_b, actual_b):
    x = x_ref[...].astype(jnp.float32)                          # (TB, C) f32

    # Numerically-stable logsumexp along the class (lane) axis.
    m = jnp.max(x, axis=1, keepdims=True)                       # (TB, 1)
    lse = jnp.log(jnp.sum(jnp.exp(x - m), axis=1, keepdims=True)) + m

    # Fused smoothed-target weighted reduction:
    #   w_j = eps/C + (1-eps) * [j == target];   wx = sum_j w_j * x_j
    # (one select + one multiply + one reduce, instead of two reductions).
    cols = lax.broadcasted_iota(jnp.int32, x.shape, 1)          # (TB, C)
    base_w = jnp.float32(epsilon / num_classes)
    hit_w = jnp.float32(epsilon / num_classes + (1.0 - epsilon))
    w = jnp.where(cols == t_ref[...], hit_w, base_w)            # (TB, C)
    wx = jnp.sum(w * x, axis=1, keepdims=True)                  # (TB, 1)

    per_row = lse - wx                                          # (TB, 1)

    # Mask rows that only exist because of batch padding.
    row_ids = (pl.program_id(0) * tile_b
               + lax.broadcasted_iota(jnp.int32, (tile_b, 1), 0))
    per_row = jnp.where(row_ids < actual_b, per_row, 0.0)

    # Per-tile partial sum, written lane-dense into this tile's own block
    # (no shared accumulator -> the batch grid axis stays "parallel").
    out_ref[...] = jnp.full((1, 8, 128), jnp.sum(per_row), dtype=jnp.float32)


def _per_row_vmem_bytes(c_pad, itemsize):
    """VMEM bytes one batch row actually costs:
    double-buffered lane-padded logits block, double-buffered lane-padded
    int32 targets block (1 col pads to 128 lanes), plus ~3 full-width f32
    in-kernel temporaries (upcast copy, exp(x-m), w*x)."""
    return 2 * c_pad * itemsize + 2 * 128 * 4 + 3 * c_pad * 4


def _pick_tile_b(batch, c_pad, itemsize, vmem_cap_bytes):
    """Largest batch tile (multiple of 8) whose real VMEM footprint fits a
    generation-aware budget, additionally capped so the grid has >= 2 tiles
    whenever the batch allows it (megacore split on v7x, free elsewhere)."""
    big_vmem = vmem_cap_bytes >= 96 * 1024 * 1024        # v5e/v6e: 128 MiB
    budget = (32 << 20) if big_vmem else (16 << 20)      # v7x: 64 MiB/TC
    per_row = _per_row_vmem_bytes(c_pad, itemsize)
    tb = budget // per_row
    tb = max(8, min((tb // 8) * 8, 2048))
    b_pad8 = ((batch + 7) // 8) * 8
    if b_pad8 >= 16:
        # Guarantee at least two grid tiles so "parallel" can span both TCs.
        tb = min(tb, max(8, ((b_pad8 // 2) // 8) * 8))
    return min(tb, max(8, b_pad8)), big_vmem, per_row


def _xla_cross_entropy_label_smooth(inputs, targets, num_classes, epsilon):
    log_probs = jax.nn.log_softmax(inputs.astype(jnp.float32), axis=1)
    onehot = jax.nn.one_hot(targets, num_classes, dtype=jnp.float32)
    t = (1.0 - epsilon) * onehot + epsilon / num_classes
    return (-t * log_probs).mean(0).sum()


def cross_entropy_label_smooth(inputs, targets, *, num_classes, epsilon,
                               tile_b=None, buffer_count=2):
    """inputs: (B, C) float logits (f32 or bf16 — kernel upcasts);
    targets: (B,) int class ids in [0, C). Returns scalar f32 loss."""
    B, C = inputs.shape
    assert C == num_classes

    # Lane-sparse small vocabularies: a (TB, C<128) block uses <100% of each
    # vreg's lanes and inflates the VMEM block over the HBM bytes — plain XLA
    # is at least as good there.
    if C < 128:
        return _xla_cross_entropy_label_smooth(inputs, targets, num_classes,
                                               epsilon)

    itemsize = jnp.dtype(inputs.dtype).itemsize
    c_pad = ((C + 127) // 128) * 128                    # lane padding in VMEM
    try:
        vmem_cap = pltpu.get_tpu_info().vmem_capacity_bytes
    except Exception:
        vmem_cap = 64 * 1024 * 1024                     # assume smallest (v7x)

    if tile_b is None:
        tile_b, big_vmem, per_row_bytes = _pick_tile_b(B, c_pad, itemsize,
                                                       vmem_cap)
    else:
        tile_b = max(8, (int(tile_b) // 8) * 8)
        big_vmem = vmem_cap >= 96 * 1024 * 1024
        per_row_bytes = _per_row_vmem_bytes(c_pad, itemsize)

    # Pad the batch to a tile multiple; padded rows are masked in-kernel.
    B_pad = ((B + tile_b - 1) // tile_b) * tile_b
    num_tiles = B_pad // tile_b
    if B_pad != B:
        inputs = jnp.pad(inputs, ((0, B_pad - B), (0, 0)))
        targets = jnp.pad(targets, ((0, B_pad - B),))
    targets_2d = targets.astype(jnp.int32).reshape(B_pad, 1)

    kernel = functools.partial(
        _ce_label_smooth_kernel,
        epsilon=float(epsilon),
        num_classes=int(num_classes),
        tile_b=int(tile_b),
        actual_b=int(B),
    )

    # Scoped-VMEM request: the real footprint of the chosen tile plus slack,
    # clamped generation-aware (128 MiB chips can afford more than v7x's 64).
    needed_vmem = tile_b * per_row_bytes + 2 * 8 * 128 * 4 + (4 << 20)
    vmem_limit = min(max(needed_vmem, 16 << 20),
                     (64 << 20) if big_vmem else (40 << 20))

    cost = pl.CostEstimate(
        flops=6 * B_pad * C,
        transcendentals=B_pad * C + B_pad,
        bytes_accessed=B_pad * C * itemsize + B_pad * 4 + num_tiles * 8 * 128 * 4,
    )

    logits_spec = pl.BlockSpec((tile_b, C), lambda i: (i, 0))
    if buffer_count > 2:
        # Deeper prefetch knob: only spend the extra VMEM if a profile shows
        # exposed DMA at the chosen tile (most likely on v7x).
        logits_spec = pl.BlockSpec((tile_b, C), lambda i: (i, 0),
                                   pipeline_mode=pl.Buffered(buffer_count))

    partials = pl.pallas_call(
        kernel,
        out_shape=jax.ShapeDtypeStruct((num_tiles, 8, 128), jnp.float32),
        grid_spec=pltpu.PrefetchScalarGridSpec(
            num_scalar_prefetch=0,
            grid=(num_tiles,),
            in_specs=[
                logits_spec,
                pl.BlockSpec((tile_b, 1), lambda i: (i, 0)),
            ],
            out_specs=pl.BlockSpec((1, 8, 128), lambda i: (i, 0, 0)),
        ),
        compiler_params=pltpu.CompilerParams(
            dimension_semantics=("parallel",),   # independent per-tile partials
            vmem_limit_bytes=int(vmem_limit),
        ),
        cost_estimate=cost,
    )(inputs, targets_2d)

    # Final reduction + mean(0) scale (== sum_all / B) in plain JAX.
    return jnp.sum(partials[:, 0, 0]) * jnp.float32(1.0 / B)


def _reference(inputs, targets, num_classes, epsilon):
    return _xla_cross_entropy_label_smooth(inputs, targets, num_classes,
                                           epsilon)


if __name__ == "__main__":
    epsilon = 0.1
    key = jax.random.PRNGKey(0)

    # Test 1: ImageNet-like classes (C=1000, lane-dense), small batch.
    B, C = 16, 1000
    k_x, k_t = jax.random.split(key)
    inputs = jax.random.normal(k_x, (B, C), dtype=jnp.float32)
    targets = jax.random.randint(k_t, (B,), 0, C, dtype=jnp.int32)
    loss = jax.block_until_ready(
        cross_entropy_label_smooth(inputs, targets, num_classes=C,
                                   epsilon=epsilon))
    ref = _reference(inputs, targets, C, epsilon)
    assert jnp.allclose(loss, ref, rtol=1e-5, atol=1e-5), (loss, ref)

    # Test 2: ragged batch (exercises the padded-row mask + 2-tile grid).
    B2 = 13
    k_x2, k_t2 = jax.random.split(jax.random.fold_in(key, 1))
    inputs2 = jax.random.normal(k_x2, (B2, C), dtype=jnp.float32)
    targets2 = jax.random.randint(k_t2, (B2,), 0, C, dtype=jnp.int32)
    loss2 = jax.block_until_ready(
        cross_entropy_label_smooth(inputs2, targets2, num_classes=C,
                                   epsilon=epsilon))
    ref2 = _reference(inputs2, targets2, C, epsilon)
    assert jnp.allclose(loss2, ref2, rtol=1e-5, atol=1e-5), (loss2, ref2)

    # Test 3: bf16 logits (kernel upcasts once in VMEM).
    B3, C3 = 16, 256
    k_x3, k_t3 = jax.random.split(jax.random.fold_in(key, 2))
    inputs3 = jax.random.normal(k_x3, (B3, C3), dtype=jnp.bfloat16)
    targets3 = jax.random.randint(k_t3, (B3,), 0, C3, dtype=jnp.int32)
    loss3 = jax.block_until_ready(
        cross_entropy_label_smooth(inputs3, targets3, num_classes=C3,
                                   epsilon=epsilon))
    ref3 = _reference(inputs3, targets3, C3, epsilon)
    assert jnp.allclose(loss3, ref3, rtol=1e-4, atol=1e-4), (loss3, ref3)

    print("KERNEL_OK")
</pallas_src>

<mosaic_0001>
module attributes {stable_mosaic.version = 11 : i64} {
  func.func @_ce_label_smooth_kernel(%arg0: i32, %arg1: memref<8x1000xf32, #tpu.memory_space<vmem>>, %arg2: memref<8x1xi32, #tpu.memory_space<vmem>>, %arg3: memref<1x8x128xf32, #tpu.memory_space<vmem>>) attributes {dimension_semantics = [#tpu.dimension_semantics<parallel>], iteration_bounds = array<i64: 2>, scalar_prefetch = 0 : i64, scratch_operands = 0 : i64, tpu.core_type = #tpu.core_type<tc>, window_params = [{transform_indices = @transform_0, window_bounds = array<i64: 8, 1000>}, {transform_indices = @transform_1, window_bounds = array<i64: 8, 1>}, {transform_indices = @transform_2, window_bounds = array<i64: 1, 8, 128>}]} {
    %c0 = arith.constant 0 : index
    %c0_0 = arith.constant 0 : index
    %0 = vector.load %arg1[%c0, %c0_0] : memref<8x1000xf32, #tpu.memory_space<vmem>>, vector<8x1000xf32>
    %cst = arith.constant dense<0xFF800000> : vector<8xf32>
    %1 = vector.multi_reduction <maximumf>, %0, %cst [1] : vector<8x1000xf32> to vector<8xf32>
    %2 = vector.shape_cast %1 : vector<8xf32> to vector<8x1xf32>
    %3 = vector.broadcast %2 : vector<8x1xf32> to vector<8x1000xf32>
    %4 = arith.subf %0, %3 : vector<8x1000xf32>
    %5 = math.exp %4 : vector<8x1000xf32>
    %cst_1 = arith.constant dense<0.000000e+00> : vector<8xf32>
    %6 = vector.multi_reduction <add>, %5, %cst_1 [1] : vector<8x1000xf32> to vector<8xf32>
    %7 = vector.shape_cast %6 : vector<8xf32> to vector<8x1xf32>
    %8 = math.log %7 : vector<8x1xf32>
    %9 = arith.addf %8, %2 : vector<8x1xf32>
    %10 = tpu.iota {dimensions = array<i32: 1>} : vector<8x1000xi32>
    %c0_2 = arith.constant 0 : index
    %c0_3 = arith.constant 0 : index
    %11 = vector.load %arg2[%c0_2, %c0_3] : memref<8x1xi32, #tpu.memory_space<vmem>>, vector<8x1xi32>
    %12 = vector.broadcast %11 : vector<8x1xi32> to vector<8x1000xi32>
    %13 = arith.cmpi eq, %10, %12 : vector<8x1000xi32>
    %cst_4 = arith.constant 9.001000e-01 : f32
    %cst_5 = arith.constant 9.99999974E-5 : f32
    %14 = vector.broadcast %cst_4 : f32 to vector<8x1000xf32>
    %15 = vector.broadcast %cst_5 : f32 to vector<8x1000xf32>
    %16 = arith.select %13, %14, %15 : vector<8x1000xi1>, vector<8x1000xf32>
    %17 = arith.mulf %16, %0 : vector<8x1000xf32>
    %cst_6 = arith.constant dense<0.000000e+00> : vector<8xf32>
    %18 = vector.multi_reduction <add>, %17, %cst_6 [1] : vector<8x1000xf32> to vector<8xf32>
    %19 = vector.shape_cast %18 : vector<8xf32> to vector<8x1xf32>
    %20 = arith.subf %9, %19 : vector<8x1xf32>
    %c8_i32 = arith.constant 8 : i32
    %21 = arith.muli %arg0, %c8_i32 : i32
    %22 = tpu.iota {dimensions = array<i32: 0>} : vector<8x1xi32>
    %23 = vector.broadcast %21 : i32 to vector<8x1xi32>
    %24 = arith.addi %23, %22 : vector<8x1xi32>
    %c16_i32 = arith.constant 16 : i32
    %25 = vector.broadcast %c16_i32 : i32 to vector<8x1xi32>
    %26 = arith.cmpi slt, %24, %25 : vector<8x1xi32>
    %cst_7 = arith.constant 0.000000e+00 : f32
    %27 = vector.broadcast %cst_7 : f32 to vector<8x1xf32>
    %28 = arith.select %26, %20, %27 : vector<8x1xi1>, vector<8x1xf32>
    %29 = vector.shape_cast %28 : vector<8x1xf32> to vector<1x8x1xf32>
    %cst_8 = arith.constant dense<0.000000e+00> : vector<1xf32>
    %30 = vector.multi_reduction <add>, %29, %cst_8 [1, 2] : vector<1x8x1xf32> to vector<1xf32>
    %31 = vector.shape_cast %30 : vector<1xf32> to vector<1x1x1xf32>
    %32 = vector.extract %31[0, 0, 0] : f32 from vector<1x1x1xf32>
    %33 = vector.broadcast %32 : f32 to vector<1x8x128xf32>
    %c0_9 = arith.constant 0 : index
    %c0_10 = arith.constant 0 : index
    %c0_11 = arith.constant 0 : index
    %34 = vector.load %arg3[%c0_9, %c0_10, %c0_11] : memref<1x8x128xf32, #tpu.memory_space<vmem>>, vector<1x8x128xf32>
    tpu.vector_store %arg3[%c0_9, %c0_10, %c0_11], %33 {strides = array<i32>} : memref<1x8x128xf32, #tpu.memory_space<vmem>>, vector<1x8x128xf32>,
    return
  }
  func.func @transform_0(%arg0: i32) -> (i32, i32) {
    %c0_i32 = arith.constant 0 : i32
    %c0_i32_0 = arith.constant 0 : i32
    return %arg0, %c0_i32 : i32, i32
  }
  func.func @transform_1(%arg0: i32) -> (i32, i32) {
    %c0_i32 = arith.constant 0 : i32
    %c0_i32_0 = arith.constant 0 : i32
    return %arg0, %c0_i32 : i32, i32
  }
  func.func @transform_2(%arg0: i32) -> (i32, i32, i32) {
    %c0_i32 = arith.constant 0 : i32
    %c0_i32_0 = arith.constant 0 : i32
    %c0_i32_1 = arith.constant 0 : i32
    return %arg0, %c0_i32, %c0_i32_0 : i32, i32, i32
  }
}

</mosaic_0001>

<bundles_post_ra>
// kernel: tpu_custom_call.1
= control target key start
LH: loop header
LB: loop body
LE: loop exit
PB: predicated region body
PF: predicated region fallthrough
CT: control target
= control target key end

     0   :  { %7 = vsyncpa [#allocation3], 0  ;;  %s805_s0 = inlined_call_operand.hbm [shape: f32[16,1000], index: 0, kind: input, shape index: {}]   ;;  %s806_s1 = inlined_call_operand.vmem [shape: s32[16,1], index: 1, kind: input, shape index: {}]   ;;  %s807_s2 = inlined_call_operand.hbm [shape: f32[2,8,128], index: 2, kind: output, shape index: {}]  }
   0x1   :  { %9 = vsyncpa [#allocation3 + $0x1], 0 }
   0x2   :  { %10 = vsyncpa [#allocation4], 0 }
   0x3   :  { %12 = vsyncpa [#allocation4 + $0x1], 0  ;;  %s595_s9 = smov 0   ;;  %s597_s10 = smov 0  }
   0x4   :  { %s599_s11 = smov 0   ;;  %s601_s12 = smov 0  }
   0x5 LB: > { %s616_s13 = sadd.s32 4294967295, %s574_s12   ;;  %s397_s14 = sadd.s32 4294967294, %s574_s12   ;;  %s574_s12 = sphi %s601_s12, %s824_s12   ;;  %s570_s11 = sphi %s599_s11, %s823_s11   ;;  %s566_s10 = sphi %s597_s10, %s822_s10   ;;  %s562_s9 = sphi %s595_s9, %s821_s9  }
   0x6   : > { %s620_s15 = sadd.s32 1, %s574_s12   ;;  %s25_s16 = sadd.s32 1, %s570_s11 }
   0x7   : > { %s22_s17 = ssub.s32 %s574_s12, %s620_s15  ;;  %p32_p0 = scmp.ne.s32.totalorder %s570_s11, %s566_s10 }
   0x8   : > { %p23_p1 = scmp.eq.s32.totalorder %s22_s17, 0  ;;  %p33_p2 = scmp.eq.s32.totalorder %s574_s12, 0 }
   0x9   : > { %p38_p3 = scmp.ne.s32.totalorder %s566_s10, %s562_s9  ;;  %p39_p4 = scmp.eq.s32.totalorder %s616_s13, 0 }
   0xa   : > { %s632_s18 = scalar_select %p23_p1, %s570_s11, %s25_s16  }
   0xb   : > { %p634_p5 = por %p33_p2, %p32_p0  ;;  %p638_p6 = por %p39_p4, %p38_p3 }
   0xc   : > { %p88_p7 = scmp.eq.s32.totalorder %s616_s13, 1  ;;  %p94_p8 = scmp.eq.s32.totalorder %s397_s14, 1 }
   0xd   : > { %s811_s20 = scalar_select %p638_p6, 1, 0 }
   0xe   : > { %p427_p10 = scmp.lt.s32.totalorder %s574_s12, 2  ;;  %p645_p11 = por %p88_p7, %p32_p0 }
   0xf   : > { %p649_p12 = por %p94_p8, %p38_p3  ;;  %s114_s23 = sand.u32 1, %s570_s11  }
  0x10   : > { %s812_s21 = scalar_select %p645_p11, 1, 0 }
  0x11   : > { %s813_s22 = scalar_select %p649_p12, 1, 0 }
  0x12   : > { %s412_s24 = sshll.u32 %s574_s12, 10  ;;  %s400_s25 = sshll.u32 %s114_s23, 6 }
  0x13   : > { %s658_s28 = scalar_lea.hbm %s805_s0, %s412_s24  ;;  %s118_s29 = scalar_lea.vmem [#allocation2], %s400_s25 }
  0x14   : > { %s126_s30 = sshll.u32 %s118_s29, 4  ;;  %p662_p13 = pnand %p427_p10, %p634_p5  ;;  %s666_s30 = int_to_ptr.vmem [resolvable:$true] %s126_s30 }
  0x15   : > { %s115_s4 = scalar_lea.sflag [#allocation3], %s114_s23  ;;  %s482_s5 = scalar_lea.hbm %s658_s28, 1024 }
  0x16   : > { %p483_p2 = scmp.ne.s32.totalorder %s658_s28, %s482_s5  ;;  %p484_p3 = pneg %p662_p13 }
  0x17   : > { %s487_s8 = scalar_lea.hbm %s805_s0, 2048  ;;  %p488_p5 = scmp.lt.s32.totalorder %s658_s28, %s805_s0 }
  0x18   : > { %p485_p4 = pnand %p484_p3, %p483_p2  ;;  %p489_p8 = scmp.lt.s32.totalorder %s487_s8, %s482_s5 }
  0x1a   : > { %p486_p7 = pneg %p485_p4  ;;  %p490_p10 = por %p489_p8, %p488_p5 }
  0x1c   : > { %p491_p9 = pnand %p490_p10, %p486_p7 }
  0x1e   : > { %494 = shalt.err (!%p491_p9)
}
  0x1f   : > { %s495_s17 = scalar_lea.vmem %s666_s30, 1024  ;;  %s576_s19 = smov [#allocation2]  }
  0x20   : > { %p496_p0 = scmp.ne.s32.totalorder %s666_s30, %s495_s17  ;;  %s500_s23 = sshll.u32 %s576_s19, 4  ;;  %s501_s23 = int_to_ptr.vmem [resolvable:$false] %s500_s23 }
  0x21   : > { %s502_s24 = scalar_lea.vmem %s501_s23, 2048  ;;  %p503_p4 = scmp.lt.s32.totalorder %s666_s30, %s501_s23 }
  0x22   : > { %p498_p1 = pnand %p496_p0, %p484_p3  ;;  %p504_p12 = scmp.lt.s32.totalorder %s502_s24, %s495_s17 }
  0x24   : > { %p499_p2 = pneg %p498_p1  ;;  %p505_p11 = por %p504_p12, %p503_p4 }
  0x26   : > { %p506_p6 = pnand %p505_p11, %p499_p2 }
  0x28   : > { %509 = shalt.err (!%p506_p6)
}
  0x29   : > { %422 = dma.hbm_to_vmem [thread:$0]  (!%p662_p13), %s658_s28, 1024, %s666_s30, %s115_s4  }
  0x2a   : > { %p815_p9 = scmp.lt.s32.totalorder %s574_s12, 3  ;;  %p816_p7 = scmp.ge.s32.totalorder %s574_s12, 1 }
  0x2c   : > { %p139_p0 = pnand %p816_p7, %p815_p9 }
  0x2d   : > { %s693_s25 = sand.u32 (!%p139_p0), 1, %s566_s10   ;;  %p817_p6 = scmp.ne.s32.totalorder (!%p139_p0), %s811_s20, 0 }
  0x2e   : > { %142 = sbr.rel (%p139_p0) target bundleno = 607 (0x25f), region = 28  ;;  %s404_s26 = sshll.u32 (!%p139_p0), %s693_s25, 6 }
  0x2f   : > { %s145_s27 = scalar_lea.sflag (!%p139_p0), [#allocation3], %s693_s25  ;;  %s148_s29 = scalar_lea.vmem (!%p139_p0), [#allocation2], %s404_s26 }
  0x33   : > { %553 = dma.done.wait (%p817_p6), %s145_s27, 1024  }
  0x34   : > { %555 = vsyncadd (%p817_p6), %s145_s27, 4294966272  ;;  %v577_v0 = vmov 0   ;;  %v701_v1 = vld [vmem:[%s148_s29] sm:$0xff]  ;;  %v703_v2 = vld [vmem:[%s148_s29 + $0x8] sm:$0xff]  ;;  %vm188_vm0 = vcmask 850944   ;;  %p173_p11 = scmp.lt.s32.totalorder %s616_s13, 1  ;;  %v233_v18 = vlaneseq }
  0x35   : > { %463 = vset.pattern.permute.xlu0 %v577_v0  ;;  %v705_v3 = vld [vmem:[%s148_s29 + $0x10] sm:$0xff]  ;;  %v707_v4 = vld [vmem:[%s148_s29 + $0x18] sm:$0xff]  ;;  %v709_v5 = vld [vmem:[%s148_s29 + $0x20] sm:$0xff]  ;;  %v578_v43 = vmov 0.0001   ;;  %s407_s5 = sshll.u32 %s616_s13, 3 }
  0x36   : > { %v711_v6 = vld [vmem:[%s148_s29 + $0x28] sm:$0xff]  ;;  %v713_v7 = vld [vmem:[%s148_s29 + $0x30] sm:$0xff]  ;;  %v715_v8 = vld [vmem:[%s148_s29 + $0x38] sm:$0xff]  ;;  %v185_v9 = vmax.f32 %v701_v1, %v709_v5  ;;  %s174_s20 = scalar_select %p173_p11, %s616_s13, 1  ;;  %v234_v23 = vand.u32 127, %v233_v18  ;;  %vm288_vm10 = vcmask 7168  }
  0x37   : > { %v186_v10 = vmax.f32 %v703_v2, %v711_v6  ;;  %v187_v11 = vmax.f32 %v705_v3, %v713_v7  ;;  %v189_v12 = vsel %vm188_vm0, %v715_v8, -inf  ;;  %s405_s6 = sshll.u32 %s693_s25, 3  ;;  %s409_s14 = sshll.u32 %s616_s13, 7 }
  0x38   : > { %v190_v13 = vmax.f32 %v707_v4, %v189_v12  ;;  %s406_s28 = sshll.u32 %s174_s20, 3  ;;  %v235_v29 = vadd.s32 128, %v234_v23  ;;  %v236_v30 = vadd.s32 256, %v234_v23  ;;  %v237_v33 = vadd.s32 384, %v234_v23  ;;  %s172_s7 = scalar_lea.vmem [#allocation5], %s405_s6 }
  0x39   : > { %v191_v14 = vmax.f32 %v185_v9, %v186_v10  ;;  %s176_s4 = scalar_lea.vmem %s806_s1, %s406_s28  ;;  %v238_v38 = vadd.s32 512, %v234_v23  ;;  %v239_v40 = vadd.s32 640, %v234_v23  ;;  %v240_v51 = vadd.s32 768, %v234_v23  ;;  %s315_s8 = sshll.u32 %s172_s7, 4  ;;  %s765_s8 = int_to_ptr.vmem [resolvable:$true] %s315_s8 }
  0x3a   : > { %v192_v15 = vmax.f32 %v187_v11, %v190_v13  ;;  %v242_v17 = vld [vmem:[%s176_s4] sm:$0xff]  ;;  %v241_v55 = vadd.s32 896, %v234_v23  ;;  %s313_s23 = scalar_lea.hbm %s807_s2, %s409_s14  ;;  %s302_s24 = scalar_lea.sflag [#allocation4], %s693_s25 }
  0x3b   : > { %s510_s26 = scalar_lea.vmem %s765_s8, 128  ;;  %p818_p13 = scmp.ne.s32.totalorder %s812_s21, 0 }
  0x3c   : > { %v193_v16 = vmax.f32 %v191_v14, %v192_v15  ;;  %p511_p12 = scmp.ne.s32.totalorder %s765_s8, %s510_s26  ;;  %s579_s27 = smov [#allocation5]  }
  0x3d   : > { %s514_s13 = sshll.u32 %s579_s27, 4  ;;  %s515_s13 = int_to_ptr.vmem [resolvable:$false] %s514_s13 }
  0x3e   : > { %194 = vmax.xlane.f32.xlu0 %v193_v16  ;;  %p512_p1 = pnand %p511_p12, %p818_p13  ;;  %s516_s29 = scalar_lea.vmem %s515_s13, 256 }
  0x3f   : > { %p517_p5 = scmp.lt.s32.totalorder %s765_s8, %s515_s13  ;;  %p518_p8 = scmp.lt.s32.totalorder %s516_s29, %s510_s26 }
  0x40   : > { %p513_p3 = pneg %p512_p1 }
  0x41   : > { %p519_p10 = por %p518_p8, %p517_p5 }
  0x43   : > { %p520_p2 = pnand %p519_p10, %p513_p3 }
  0x54   : > { %244 = vperm.xlu0 %463, %v242_v17  }
  0xc7   : > { %v731_v19 = vpop.xlane.xlu0 %194 }
  0xc8   : > { %v196_v20 = vsub.f32 %v701_v1, %v731_v19  ;;  %v197_v21 = vsub.f32 %v703_v2, %v731_v19  ;;  %v198_v22 = vsub.f32 %v705_v3, %v731_v19  ;;  %v199_v24 = vsub.f32 %v707_v4, %v731_v19 }
  0xc9   : > { %v200_v27 = vsub.f32 %v709_v5, %v731_v19  ;;  %v201_v31 = vsub.f32 %v711_v6, %v731_v19  ;;  %v202_v34 = vsub.f32 %v713_v7, %v731_v19  ;;  %v203_v35 = vsub.f32 %v715_v8, %v731_v19 }
  0xca   : > { %v204_v25 = vmul.f32 1.442695, %v196_v20  ;;  %v206_v26 = vmul.f32 1.442695, %v197_v21  ;;  %v208_v28 = vmul.f32 1.442695, %v198_v22 }
  0xcb   : > { %v210_v32 = vmul.f32 1.442695, %v199_v24  ;;  %v212_v37 = vmul.f32 1.442695, %v200_v27  ;;  %v214_v39 = vmul.f32 1.442695, %v201_v31  ;;  %v284_v27 = vstv %s407_s5 }
  0xcc   : > { %464 = vpow2.f32 %v204_v25  ;;  %v216_v41 = vmul.f32 1.442695, %v202_v34  ;;  %v218_v42 = vmul.f32 1.442695, %v203_v35 }
  0xcd   : > { %466 = vpow2.f32 %v206_v26 }
  0xce   : > { %468 = vpow2.f32 %v208_v28 }
  0xcf   : > { %v245_v36 = vpop.permute.xlu0 %244  ;;  %470 = vpow2.f32 %v210_v32 }
  0xd0   : > { %vm246_vm1 = vcmp.eq.s32.totalorder %v234_v23, %v245_v36  ;;  %vm247_vm2 = vcmp.eq.s32.totalorder %v235_v29, %v245_v36  ;;  %vm248_vm3 = vcmp.eq.s32.totalorder %v236_v30, %v245_v36  ;;  %vm249_vm4 = vcmp.eq.s32.totalorder %v237_v33, %v245_v36 }
  0xd1   : > { %v254_v44 = vsel %vm246_vm1, 0.9001, %v578_v43  ;;  %472 = vpow2.f32 %v212_v37  ;;  %vm250_vm5 = vcmp.eq.s32.totalorder %v238_v38, %v245_v36  ;;  %v255_v45 = vsel %vm247_vm2, 0.9001, %v578_v43 }
  0xd2   : > { %v256_v46 = vsel %vm248_vm3, 0.9001, %v578_v43  ;;  %v257_v47 = vsel %vm249_vm4, 0.9001, %v578_v43  ;;  %v262_v48 = vmul.f32 %v254_v44, %v701_v1  ;;  %474 = vpow2.f32 %v214_v39 }
  0xd3   : > { %v263_v49 = vmul.f32 %v255_v45, %v703_v2  ;;  %v264_v50 = vmul.f32 %v256_v46, %v705_v3  ;;  %476 = vpow2.f32 %v218_v42  ;;  %v258_v52 = vsel %vm250_vm5, 0.9001, %v578_v43 }
  0xd4   : > { %478 = vpow2.f32 %v216_v41  ;;  %vm251_vm6 = vcmp.eq.s32.totalorder %v239_v40, %v245_v36  ;;  %v265_v53 = vmul.f32 %v257_v47, %v707_v4  ;;  %v266_v57 = vmul.f32 %v258_v52, %v709_v5 }
  0xd5   : > { %v270_v54 = vadd.f32 %v263_v49, %v262_v48  ;;  %v259_v60 = vsel %vm251_vm6, 0.9001, %v578_v43  ;;  %vm252_vm7 = vcmp.eq.s32.totalorder %v240_v51, %v245_v36  ;;  %vm253_vm8 = vcmp.eq.s32.totalorder %v241_v55, %v245_v36 }
  0xd6   : > { %v267_v1 = vmul.f32 %v259_v60, %v711_v6  ;;  %v260_v9 = vsel %vm252_vm7, 0.9001, %v578_v43  ;;  %v261_v10 = vsel %vm253_vm8, 0.9001, %v578_v43 }
  0xd7   : > { %v271_v58 = vadd.f32 %v270_v54, %v264_v50  ;;  %v268_v5 = vmul.f32 %v260_v9, %v713_v7  ;;  %v269_v15 = vmul.f32 %v261_v10, %v715_v8  ;;  %v283_v7 = vshrl.u32 %v233_v18, 7 }
  0xd9   : > { %v465_v56 = vpop.eup %464  ;;  %v272_v62 = vadd.f32 %v271_v58, %v265_v53  ;;  %v276_v23 = vsel %vm188_vm0, %v269_v15, 0.0  ;;  %v285_v28 = vadd.s32 %v284_v27, %v283_v7 }
  0xda   : > { %v467_v59 = vpop.eup %466 }
  0xdb   : > { %v220_v61 = vadd.f32 %v467_v59, %v465_v56  ;;  %v469_v63 = vpop.eup %468  ;;  %v273_v2 = vadd.f32 %v272_v62, %v266_v57  ;;  %vm286_vm9 = vcmp.lt.s32.totalorder %v285_v28, 16 }
  0xdc   : > { %v471_v3 = vpop.eup %470 }
  0xdd   : > { %v221_v0 = vadd.f32 %v469_v63, %v220_v61  ;;  %v274_v13 = vadd.f32 %v273_v2, %v267_v1 }
  0xde   : > { %v473_v11 = vpop.eup %472 }
  0xdf   : > { %v222_v4 = vadd.f32 %v471_v3, %v221_v0  ;;  %v475_v14 = vpop.eup %474  ;;  %v275_v22 = vadd.f32 %v274_v13, %v268_v5 }
  0xe0   : > { %v477_v16 = vpop.eup %476 }
  0xe1   : > { %v223_v12 = vadd.f32 %v473_v11, %v222_v4  ;;  %v479_v20 = vpop.eup %478  ;;  %v226_v6 = vsel %vm188_vm0, %v477_v16, 0.0  ;;  %v277_v25 = vadd.f32 %v276_v23, %v275_v22 }
  0xe3   : > { %v224_v17 = vadd.f32 %v475_v14, %v223_v12 }
  0xe5   : > { %v225_v21 = vadd.f32 %v479_v20, %v224_v17 }
  0xe7   : > { %v227_v24 = vadd.f32 %v226_v6, %v225_v21 }
  0xe9   : > { %228 = vadd.xlane.f32.xlu1 %v227_v24 }
  0xed   : > { %278 = vadd.xlane.f32.xlu1 %v277_v25 }
 0x172   : > { %v229_v26 = vpop.xlane.xlu1 %228 }
 0x173   : > { %480 = vlog2.f32 %v229_v26 }
 0x176   : > { %v279_v31 = vpop.xlane.xlu1 %278 }
 0x180   : > { %v481_v8 = vpop.eup %480 }
 0x181   : > { %v231_v29 = vmul.f32 0.6931472, %v481_v8 }
 0x183   : > { %v232_v30 = vadd.f32 %v231_v29, %v731_v19 }
 0x185   : > { %v280_v32 = vsub.f32 %v232_v30, %v279_v31 }
 0x187   : > { %v287_v33 = vsel %vm286_vm9, %v280_v32, 0.0 }
 0x188   : > { %v289_v34 = vsel %vm288_vm10, %v287_v33, 0.0 }
 0x189   : > { %290 = vadd.xlane.f32.xlu1 %v289_v34 }
 0x212   : > { %v291_v35 = vpop.xlane.xlu1 %290 }
 0x213   : > { %v292_v36 = vrot.slane %v291_v35, 4 }
 0x215   : > { %v293_v37 = vadd.f32 %v292_v36, %v291_v35 }
 0x217   : > { %v294_v18 = vrot.slane %v293_v37, 2 }
 0x219   : > { %v295_v38 = vadd.f32 %v294_v18, %v293_v37 }
 0x21b   : > { %v296_v39 = vrot.slane %v295_v38, 1 }
 0x21d   : > { %v297_v40 = vadd.f32 %v296_v39, %v295_v38 }
 0x21f   : > { %413 = vpush %v297_v40 }
 0x250   : > { %s414_s16 = spop %413 }
 0x251   : > { %v299_v19 = vstv %s414_s16 }
 0x252   : > { %300 = vst [vmem:[%s172_s7] sm:$0xff] %v299_v19 }
 0x253   : > { %523 = shalt.err (!%p520_p2)
}
 0x254   : > { %s524_s20 = scalar_lea.hbm %s313_s23, 128  ;;  %s528_s30 = scalar_lea.hbm %s807_s2, 256 }
 0x255   : > { %p525_p4 = scmp.ne.s32.totalorder %s313_s23, %s524_s20  ;;  %p529_p0 = scmp.lt.s32.totalorder %s313_s23, %s807_s2 }
 0x256   : > { %p530_p6 = scmp.lt.s32.totalorder %s528_s30, %s524_s20 }
 0x257   : > { %p526_p9 = pnand %p525_p4, %p818_p13 }
 0x258   : > { %p531_p11 = por %p530_p6, %p529_p0 }
 0x259   : > { %p527_p7 = pneg %p526_p9 }
 0x25b   : > { %p532_p12 = pnand %p531_p11, %p527_p7 }
 0x25d   : > { %535 = shalt.err (!%p532_p12)
}
 0x25e   : > { %417 = dma.vmem_to_hbm [thread:$0]  (%p818_p13), %s765_s8, 128, %s313_s23, %s302_s24  }
 0x25f PF: > { %s327_s5 = sand.u32 1, %s562_s9   ;;  %p819_p1 = scmp.ne.s32.totalorder %s813_s22, 0 }
 0x260   : > { %p820_p3 = scmp.ge.s32.totalorder %s574_s12, 2  ;;  %s328_s6 = scalar_lea.sflag [#allocation4], %s327_s5 }
 0x262   : > { %p424_p5 = pnand %p820_p3, %p819_p1 }
 0x264   : > { %p425_p8 = pneg %p424_p5 }
 0x266   : > { %557 = dma.done.wait (%p425_p8), %s328_s6, 128  }
 0x267   : > { %559 = vsyncadd (%p425_p8), %s328_s6, 4294967168  ;;  %p15_p10 = scmp.ge.s32.totalorder %s620_s15, 4   ;;  %s821_s9 = smov %s566_s10 }
 0x268   : > { %s822_s10 = smov %s570_s11  ;;  %s823_s11 = smov %s632_s18 }
 0x269   : > { %s824_s12 = smov %s620_s15  ;;  %17 = sbr.rel (!%p15_p10) target bundleno = 5 (0x5), region = 76 }
 0x26e   :  { %333 = vsyncpa [#allocation3], 1 }
 0x26f   :  { %335 = vsyncpa [#allocation3 + $0x1], 1 }
 0x270   :  { %336 = vsyncpa [#allocation4], 1 }
 0x271   :  { %338 = vsyncpa [#allocation4 + $0x1], 1 }

</bundles_post_ra>
